<compile_context>
chip_gen: v7x
topology: tpu7x:2x2x1
jax: 0.10.0
libtpu: 0.0.40
codegen_flags: <defaults>
</compile_context>

<pallas_src>
import functools

import jax
import jax.numpy as jnp
from jax.experimental import pallas as pl
from jax.experimental.pallas import tpu as pltpu

EPS = 1e-6
LANES = 128


def _cdiv(a, b):
    return -(-a // b)


def _dice_partials_kernel(x_ref, t_ref, isect_ref, denom_ref, *,
                          n_strips, strip, accw, chunk, spatial, grid_cols,
                          has_tail):
    """One grid step: per-row lane-partial sums for one (row-block, chunk).

    x_ref, t_ref : (RB, chunk) blocks of logits / targets (input dtype)
    isect_ref    : (RB, accw) f32, sum over this chunk of sigmoid(x) * t
    denom_ref    : (RB, accw) f32, sum over this chunk of sigmoid(x)^2 + t^2
    """
    rb = isect_ref.shape[0]
    j = pl.program_id(1)

    def accumulate(tail_col0):
        zero = jnp.zeros((rb, accw), jnp.float32)
        lane = None
        if tail_col0 is not None:
            # Hoisted out of the loop (JAX does not CSE broadcast_in_dim).
            lane = jax.lax.broadcasted_iota(jnp.int32, (rb, strip), 1) + tail_col0

        def body(q, carry):
            ia, da = carry
            off = pl.multiple_of(q * strip, strip)
            x = x_ref[:, pl.ds(off, strip)].astype(jnp.float32)
            t = t_ref[:, pl.ds(off, strip)].astype(jnp.float32)
            # sigmoid via a single EUP transcendental
            sx = 0.5 * jnp.tanh(0.5 * x) + 0.5
            if lane is not None:
                # Ragged tail: select (not multiply) so NaN/Inf in the stale
                # out-of-bounds part of the block cannot poison the sums.
                valid = (lane + q * strip) < spatial
                sx = jnp.where(valid, sx, 0.0)
                t = jnp.where(valid, t, 0.0)
            pi = sx * t
            pd = sx * sx + t * t
            # Fold the strip's 128-lane tiles into the (rb, accw) partials.
            # 128-aligned static slices of a live value pick whole vregs
            # (no relayout) -> pure VPU adds.
            for k in range(strip // accw):
                ia = ia + pi[:, k * accw:(k + 1) * accw]
                da = da + pd[:, k * accw:(k + 1) * accw]
            return ia, da

        ia, da = jax.lax.fori_loop(0, n_strips, body, (zero, zero),
                                   unroll=min(4, n_strips))
        isect_ref[...] = ia
        denom_ref[...] = da

    if not has_tail:
        accumulate(None)
    elif grid_cols == 1:
        accumulate(j * chunk)
    else:
        @pl.when(j < grid_cols - 1)
        def _full():
            accumulate(None)

        @pl.when(j == grid_cols - 1)
        def _tail():
            accumulate(j * chunk)


def _default_block_bytes():
    # 4 MiB blocks (2 inputs x 2 buffers = 16 MiB) are safe on v7x's 64 MiB
    # per-TC VMEM; go larger on 128 MiB-VMEM parts (v5e/v6e).
    try:
        info = pltpu.get_tpu_info()
        if getattr(info, "vmem_capacity_bytes", 0) >= (96 << 20):
            return 8 << 20
    except Exception:
        pass
    return 4 << 20


@functools.partial(jax.jit, static_argnames=("block_bytes",))
def _dice_loss_impl(inp, target, weight, block_bytes):
    n, c = inp.shape[0], inp.shape[1]
    s = 1
    for d in inp.shape[2:]:
        s *= d
    nr = n * c

    itemsize = int(jnp.dtype(inp.dtype).itemsize)
    # Native sublane packing: 8 rows for 4-byte, 16 for 2-byte, 32 for 1-byte.
    sub = 8 if itemsize >= 4 else (16 if itemsize == 2 else 32)
    rb = sub if nr >= sub else nr
    gi = _cdiv(nr, rb)

    if s >= LANES:
        accw = LANES
        strip = min(8 * LANES, (s // LANES) * LANES)          # <= s, mult of 128
        lanes_budget = max(strip,
                           (block_bytes // (rb * itemsize)) // strip * strip)
        chunk = min(lanes_budget, (s // strip) * strip)       # <= s, mult of strip
    else:
        accw = s
        strip = s
        chunk = s
    gj = _cdiv(s, chunk)
    n_strips = chunk // strip
    has_tail = (s % chunk) != 0

    # Free views only (no transpose, no pad): (N, C, *spatial) -> (N*C, S)
    x2 = inp.reshape(nr, s)
    t2 = target.reshape(nr, s)

    kernel = functools.partial(
        _dice_partials_kernel,
        n_strips=n_strips, strip=strip, accw=accw, chunk=chunk,
        spatial=s, grid_cols=gj, has_tail=has_tail)

    total = nr * s
    cost = pl.CostEstimate(
        flops=9 * total,
        transcendentals=total,
        bytes_accessed=2 * total * itemsize + 2 * gi * rb * gj * accw * 4)

    isect_p, denom_p = pl.pallas_call(
        kernel,
        out_shape=(
            jax.ShapeDtypeStruct((gi * rb, gj * accw), jnp.float32),
            jax.ShapeDtypeStruct((gi * rb, gj * accw), jnp.float32),
        ),
        grid_spec=pltpu.PrefetchScalarGridSpec(
            num_scalar_prefetch=0,
            grid=(gi, gj),
            in_specs=[
                pl.BlockSpec((rb, chunk), lambda i, j: (i, j)),
                pl.BlockSpec((rb, chunk), lambda i, j: (i, j)),
            ],
            out_specs=[
                pl.BlockSpec((rb, accw), lambda i, j: (i, j)),
                pl.BlockSpec((rb, accw), lambda i, j: (i, j)),
            ],
        ),
        compiler_params=pltpu.CompilerParams(
            dimension_semantics=("parallel", "parallel"),
            vmem_limit_bytes=4 * block_bytes + (8 << 20),
        ),
        cost_estimate=cost,
    )(x2, t2)

    # Tiny finalize on the host side of the kernel (pure JAX): cross-lane sum,
    # per-channel dice with weight, clamp, mean, 1 - mean.
    isect_c = isect_p[:nr].sum(axis=-1).reshape(n, c).sum(axis=0)
    denom_c = denom_p[:nr].sum(axis=-1).reshape(n, c).sum(axis=0)
    w = weight.reshape(c).astype(jnp.float32)
    dice = 2.0 * w * isect_c / jnp.maximum(denom_c, EPS)
    return 1.0 - jnp.mean(dice)


def dice_loss(inp, target, weight, block_bytes=None):
    """inp/target: (N, C, *spatial); weight: (C,) -> scalar loss (float32)."""
    if block_bytes is None:
        block_bytes = _default_block_bytes()
    return _dice_loss_impl(inp, target, weight, int(block_bytes))


def dice_loss_ref(inp, target, weight):
    c = inp.shape[1]
    x = jax.nn.sigmoid(jnp.moveaxis(inp, 1, 0).reshape(c, -1).astype(jnp.float32))
    t = jnp.moveaxis(target, 1, 0).reshape(c, -1).astype(jnp.float32)
    intersect = jnp.sum(x * t, axis=-1)
    denom = jnp.sum(x * x, axis=-1) + jnp.sum(t * t, axis=-1)
    dice = 2.0 * weight * intersect / jnp.maximum(denom, EPS)
    return 1.0 - jnp.mean(dice)


if __name__ == "__main__":
    key = jax.random.PRNGKey(0)
    k1, k2, k3, k4 = jax.random.split(key, 4)

    # Case 1: small 3D volume consistent with the module: N=2, C=4, D=H=W=8.
    N, C, D, H, W = 2, 4, 8, 8, 8
    logits = jax.random.normal(k1, (N, C, D, H, W), dtype=jnp.float32)
    target = (jax.random.uniform(k2, (N, C, D, H, W)) > 0.5).astype(jnp.float32)
    W_1 = jnp.linspace(0.5, 1.5, C, dtype=jnp.float32)  # deterministic weight buffer

    loss = jax.block_until_ready(dice_loss(logits, target, W_1))
    ref = dice_loss_ref(logits, target, W_1)
    assert jnp.allclose(loss, ref, atol=1e-4, rtol=1e-4), (loss, ref)

    # Case 2: ragged case (S=4000 not a multiple of the chunk, N*C=9 not a
    # multiple of 8) with a small block budget so the in-kernel tail masking
    # and both pl.when branches (grid_j=2) are exercised.
    N2, C2, D2, H2, W2 = 3, 3, 10, 20, 20
    logits2 = jax.random.normal(k3, (N2, C2, D2, H2, W2), dtype=jnp.float32)
    target2 = (jax.random.uniform(k4, (N2, C2, D2, H2, W2)) > 0.5).astype(jnp.float32)
    W_2 = jnp.linspace(0.8, 1.2, C2, dtype=jnp.float32)

    loss2 = jax.block_until_ready(dice_loss(logits2, target2, W_2,
                                            block_bytes=64 * 1024))
    ref2 = dice_loss_ref(logits2, target2, W_2)
    assert jnp.allclose(loss2, ref2, atol=1e-4, rtol=1e-4), (loss2, ref2)

    print("KERNEL_OK")
</pallas_src>

<mosaic_0001>
module attributes {stable_mosaic.version = 11 : i64} {
  func.func @_dice_partials_kernel(%arg0: i32, %arg1: i32, %arg2: memref<8x512xf32, #tpu.memory_space<vmem>>, %arg3: memref<8x512xf32, #tpu.memory_space<vmem>>, %arg4: memref<8x128xf32, #tpu.memory_space<vmem>>, %arg5: memref<8x128xf32, #tpu.memory_space<vmem>>) attributes {dimension_semantics = [#tpu.dimension_semantics<parallel>, #tpu.dimension_semantics<parallel>], iteration_bounds = array<i64: 1, 1>, scalar_prefetch = 0 : i64, scratch_operands = 0 : i64, tpu.core_type = #tpu.core_type<tc>, window_params = [{transform_indices = @transform_0, window_bounds = array<i64: 8, 512>}, {transform_indices = @transform_1, window_bounds = array<i64: 8, 512>}, {transform_indices = @transform_2, window_bounds = array<i64: 8, 128>}, {transform_indices = @transform_3, window_bounds = array<i64: 8, 128>}]} {
    %cst = arith.constant 0.000000e+00 : f32
    %0 = vector.broadcast %cst : f32 to vector<8x128xf32>
    %c0_i32 = arith.constant 0 : i32
    %c512_i32 = arith.constant 512 : i32
    %1 = arith.muli %c0_i32, %c512_i32 : i32
    %2 = tpu.assume_multiple %1, 512 : i32
    %c0 = arith.constant 0 : index
    %3 = arith.index_cast %2 : i32 to index
    %4 = vector.load %arg2[%c0, %3] : memref<8x512xf32, #tpu.memory_space<vmem>>, vector<8x512xf32>
    %c0_0 = arith.constant 0 : index
    %5 = arith.index_cast %2 : i32 to index
    %6 = vector.load %arg3[%c0_0, %5] : memref<8x512xf32, #tpu.memory_space<vmem>>, vector<8x512xf32>
    %cst_1 = arith.constant 5.000000e-01 : f32
    %7 = vector.broadcast %cst_1 : f32 to vector<8x512xf32>
    %8 = arith.mulf %7, %4 : vector<8x512xf32>
    %9 = math.tanh %8 : vector<8x512xf32>
    %cst_2 = arith.constant 5.000000e-01 : f32
    %10 = vector.broadcast %cst_2 : f32 to vector<8x512xf32>
    %11 = arith.mulf %10, %9 : vector<8x512xf32>
    %cst_3 = arith.constant 5.000000e-01 : f32
    %12 = vector.broadcast %cst_3 : f32 to vector<8x512xf32>
    %13 = arith.addf %11, %12 : vector<8x512xf32>
    %14 = arith.mulf %13, %6 : vector<8x512xf32>
    %15 = arith.mulf %13, %13 : vector<8x512xf32>
    %16 = arith.mulf %6, %6 : vector<8x512xf32>
    %17 = arith.addf %15, %16 : vector<8x512xf32>
    %18 = vector.extract_strided_slice %14 {offsets = [0, 0], sizes = [8, 128], strides = [1, 1]} : vector<8x512xf32> to vector<8x128xf32>
    %19 = arith.addf %0, %18 : vector<8x128xf32>
    %20 = vector.extract_strided_slice %17 {offsets = [0, 0], sizes = [8, 128], strides = [1, 1]} : vector<8x512xf32> to vector<8x128xf32>
    %21 = arith.addf %0, %20 : vector<8x128xf32>
    %22 = vector.extract_strided_slice %14 {offsets = [0, 128], sizes = [8, 128], strides = [1, 1]} : vector<8x512xf32> to vector<8x128xf32>
    %23 = arith.addf %19, %22 : vector<8x128xf32>
    %24 = vector.extract_strided_slice %17 {offsets = [0, 128], sizes = [8, 128], strides = [1, 1]} : vector<8x512xf32> to vector<8x128xf32>
    %25 = arith.addf %21, %24 : vector<8x128xf32>
    %26 = vector.extract_strided_slice %14 {offsets = [0, 256], sizes = [8, 128], strides = [1, 1]} : vector<8x512xf32> to vector<8x128xf32>
    %27 = arith.addf %23, %26 : vector<8x128xf32>
    %28 = vector.extract_strided_slice %17 {offsets = [0, 256], sizes = [8, 128], strides = [1, 1]} : vector<8x512xf32> to vector<8x128xf32>
    %29 = arith.addf %25, %28 : vector<8x128xf32>
    %30 = vector.extract_strided_slice %14 {offsets = [0, 384], sizes = [8, 128], strides = [1, 1]} : vector<8x512xf32> to vector<8x128xf32>
    %31 = arith.addf %27, %30 : vector<8x128xf32>
    %32 = vector.extract_strided_slice %17 {offsets = [0, 384], sizes = [8, 128], strides = [1, 1]} : vector<8x512xf32> to vector<8x128xf32>
    %33 = arith.addf %29, %32 : vector<8x128xf32>
    %c1_i32 = arith.constant 1 : i32
    %c0_4 = arith.constant 0 : index
    %c0_5 = arith.constant 0 : index
    %34 = vector.load %arg4[%c0_4, %c0_5] : memref<8x128xf32, #tpu.memory_space<vmem>>, vector<8x128xf32>
    tpu.vector_store %arg4[%c0_4, %c0_5], %31 {strides = array<i32>} : memref<8x128xf32, #tpu.memory_space<vmem>>, vector<8x128xf32>,
    %c0_6 = arith.constant 0 : index
    %c0_7 = arith.constant 0 : index
    %35 = vector.load %arg5[%c0_6, %c0_7] : memref<8x128xf32, #tpu.memory_space<vmem>>, vector<8x128xf32>
    tpu.vector_store %arg5[%c0_6, %c0_7], %33 {strides = array<i32>} : memref<8x128xf32, #tpu.memory_space<vmem>>, vector<8x128xf32>,
    return
  }
  func.func @transform_0(%arg0: i32, %arg1: i32) -> (i32, i32) {
    %c0_i32 = arith.constant 0 : i32
    return %arg0, %arg1 : i32, i32
  }
  func.func @transform_1(%arg0: i32, %arg1: i32) -> (i32, i32) {
    %c0_i32 = arith.constant 0 : i32
    return %arg0, %arg1 : i32, i32
  }
  func.func @transform_2(%arg0: i32, %arg1: i32) -> (i32, i32) {
    %c0_i32 = arith.constant 0 : i32
    return %arg0, %arg1 : i32, i32
  }
  func.func @transform_3(%arg0: i32, %arg1: i32) -> (i32, i32) {
    %c0_i32 = arith.constant 0 : i32
    return %arg0, %arg1 : i32, i32
  }
}

</mosaic_0001>

<bundles_post_ra>
// kernel: _dice_loss_impl.1
= control target key start
LH: loop header
LB: loop body
LE: loop exit
PB: predicated region body
PF: predicated region fallthrough
CT: control target
= control target key end

     0   :  { %s129_s0 = inlined_call_operand.vmem [shape: f32[8,512], index: 0, kind: input, shape index: {}]   ;;  %s130_s1 = inlined_call_operand.vmem [shape: f32[8,512], index: 1, kind: input, shape index: {}]   ;;  %s131_s2 = inlined_call_operand.vmem [shape: f32[8,128], index: 2, kind: output, shape index: {0}]   ;;  %s132_s3 = inlined_call_operand.vmem [shape: f32[8,128], index: 3, kind: output, shape index: {1}]  }
   0x1   :  { %v13_v0 = vld [vmem:[%s129_s0] sm:$0xff]  ;;  %v14_v1 = vld [vmem:[%s129_s0 + $0x8] sm:$0xff]  ;;  %v15_v2 = vld [vmem:[%s129_s0 + $0x10] sm:$0xff] }
   0x2   :  { %v16_v3 = vld [vmem:[%s129_s0 + $0x18] sm:$0xff]  ;;  %v21_v4 = vmul.f32 0.5, %v13_v0  ;;  %v22_v5 = vmul.f32 0.5, %v14_v1  ;;  %v23_v6 = vmul.f32 0.5, %v15_v2  ;;  %v17_v9 = vld [vmem:[%s130_s1] sm:$0xff]  ;;  %v18_v11 = vld [vmem:[%s130_s1 + $0x8] sm:$0xff] }
   0x3   :  { %v24_v7 = vmul.f32 0.5, %v16_v3  ;;  %v19_v14 = vld [vmem:[%s130_s1 + $0x10] sm:$0xff]  ;;  %v20_v17 = vld [vmem:[%s130_s1 + $0x18] sm:$0xff]  ;;  %v45_v20 = vmul.f32 %v17_v9, %v17_v9  ;;  %v46_v23 = vmul.f32 %v18_v11, %v18_v11 }
   0x4   :  { %71 = vtanh.f32 %v21_v4  ;;  %v47_v27 = vmul.f32 %v19_v14, %v19_v14  ;;  %v48_v31 = vmul.f32 %v20_v17, %v20_v17 }
   0x5   :  { %73 = vtanh.f32 %v22_v5 }
   0x6   :  { %75 = vtanh.f32 %v23_v6 }
   0x7   :  { %77 = vtanh.f32 %v24_v7 }
   0xe   :  { %v72_v8 = vpop.eup %71 }
   0xf   :  { %v74_v10 = vpop.eup %73  ;;  %v29_v12 = vmul.f32 0.5, %v72_v8 }
  0x10   :  { %v76_v13 = vpop.eup %75  ;;  %v30_v15 = vmul.f32 0.5, %v74_v10 }
  0x11   :  { %v78_v16 = vpop.eup %77  ;;  %v31_v18 = vmul.f32 0.5, %v76_v13  ;;  %v33_v19 = vadd.f32 0.5, %v29_v12 }
  0x12   :  { %v32_v21 = vmul.f32 0.5, %v78_v16  ;;  %v34_v22 = vadd.f32 0.5, %v30_v15 }
  0x13   :  { %v35_v24 = vadd.f32 0.5, %v31_v18  ;;  %v37_v25 = vmul.f32 %v33_v19, %v17_v9  ;;  %v41_v26 = vmul.f32 %v33_v19, %v33_v19 }
  0x14   :  { %v36_v28 = vadd.f32 0.5, %v32_v21  ;;  %v38_v29 = vmul.f32 %v34_v22, %v18_v11  ;;  %v42_v30 = vmul.f32 %v34_v22, %v34_v22 }
  0x15   :  { %v39_v32 = vmul.f32 %v35_v24, %v19_v14  ;;  %v43_v33 = vmul.f32 %v35_v24, %v35_v24  ;;  %v49_v34 = vadd.f32 %v45_v20, %v41_v26 }
  0x16   :  { %v40_v35 = vmul.f32 %v36_v28, %v20_v17  ;;  %v55_v36 = vadd.f32 %v38_v29, %v37_v25  ;;  %v44_v37 = vmul.f32 %v36_v28, %v36_v28  ;;  %v50_v38 = vadd.f32 %v46_v23, %v42_v30 }
  0x17   :  { %v51_v39 = vadd.f32 %v47_v27, %v43_v33 }
  0x18   :  { %v57_v40 = vadd.f32 %v55_v36, %v39_v32  ;;  %v52_v41 = vadd.f32 %v48_v31, %v44_v37  ;;  %v56_v42 = vadd.f32 %v50_v38, %v49_v34 }
  0x1a   :  { %v59_v43 = vadd.f32 %v57_v40, %v40_v35  ;;  %v58_v44 = vadd.f32 %v56_v42, %v51_v39 }
  0x1c   :  { %61 = vst [vmem:[%s131_s2] sm:$0xff] %v59_v43  ;;  %v60_v45 = vadd.f32 %v58_v44, %v52_v41 }
  0x1e   :  { %62 = vst [vmem:[%s132_s3] sm:$0xff] %v60_v45 }

</bundles_post_ra>
